<compile_context>
chip_gen: v6e
topology: v6e:2x2x1
jax: 0.10.0
libtpu: 0.0.40
codegen_flags: <defaults>
</compile_context>

<pallas_src>
import functools
import math

import jax
import jax.numpy as jnp
from jax import lax
from jax.experimental import pallas as pl
from jax.experimental.pallas import tpu as pltpu


# --------------------------- hardware / tiling policy ----------------------- #
def _vmem_capacity_bytes():
    """Physical VMEM of the current chip (per TensorCore); conservative fallback."""
    try:
        return int(pltpu.get_tpu_info().vmem_capacity_bytes)
    except Exception:
        return 64 * 1024 * 1024          # v7x per-TC size: safe lower bound


def _sublane_pack(itemsize):
    """Sublane packing of the dtype: 8 for f32, 16 for bf16, 32 for int8/fp8."""
    return max(8, 32 // max(int(itemsize), 1))


def _bytes_per_channel(N, HW, itemsize):
    """Live VMEM bytes per tile channel: double-buffered in+out blocks plus
    ~2 live f32 temporaries (x_f32 / centered x) inside the kernel."""
    return 4 * N * HW * int(itemsize) + 2 * N * HW * 4


def _choose_channel_tile(N, HW, C, itemsize, vmem_capacity):
    """Channel tile for the single-pass fused kernel.

    Policy (perf review): target ~1/3 of VMEM for the per-step working set,
    align the tile to the dtype's sublane packing, and keep >= 8 grid steps
    (>= 4 per TensorCore on v7x megacore) for DMA/compute overlap whenever the
    channel count allows it while tiles stay multi-MiB.  Returns None when even
    the smallest tile does not fit -> caller uses the two-pass HW-chunked
    fallback instead of failing to compile.
    """
    pack = _sublane_pack(itemsize)
    budget = vmem_capacity // 3
    per_ch = _bytes_per_channel(N, HW, itemsize)

    if C % pack != 0:
        # Small / unaligned channel count: one full-channel block is legal
        # (block dim == full array dim) and avoids sub-tile relayouts.
        return C if C * per_ch <= budget else None

    tiles = [t for t in range(pack, C + 1, pack) if C % t == 0]
    fit = [t for t in tiles if t * per_ch <= budget]
    if not fit:
        return None

    min_steps = 8                       # >= 4 steps per TC even on 2-TC v7x
    min_tile_bytes = 2 << 20            # per-step overhead (~0.35us) negligible above this
    good = [t for t in fit if C // t >= min_steps and t * per_ch >= min_tile_bytes]
    if good:
        return max(good)
    okay = [t for t in fit if t * per_ch >= min_tile_bytes]
    if okay:
        return min(okay)                # most grid steps with still multi-MiB tiles
    multi = [t for t in fit if C // t >= 2]
    if multi:
        return max(multi)               # >= 2 steps: some overlap + v7x megacore
    return max(fit)


def _vmem_limit_bytes(tile_elems, itemsize, vmem_capacity):
    """vmem_limit_bytes for a pallas_call whose largest per-step block has
    `tile_elems` elements: double-buffered in+out + ~3 live f32 temporaries
    + 30% headroom, clamped to the physical capacity."""
    need = int(1.3 * (4 * tile_elems * int(itemsize) + 3 * tile_elems * 4))
    return int(min(max(need, 16 * 1024 * 1024), int(vmem_capacity * 0.9)))


# ------------------------------ Pallas kernels ------------------------------ #
def _bn_lrelu_kernel(eps, negative_slope, inv_n, hw_true,
                     x_ref, wb_ref, o_ref, stat_ref):
    """Fused BatchNorm(training=True) + leaky ReLU on one (N, TC, HWp) channel tile.

    x_ref   : (N, TC, HWp) conv output WITHOUT the conv bias (any float dtype);
              lanes >= hw_true are zero padding.
    wb_ref  : (2, TC, 1) f32: row 0 = BN gamma, row 1 = BN beta.
    o_ref   : (N, TC, HWp) normalized + leaky-ReLU output, input dtype.
    stat_ref: (2, TC, 1) f32: row 0 = batch mean, row 1 = biased batch variance
              of the bias-free conv output (the wrapper adds the conv bias to the
              mean; the bias cancels everywhere else).
    """
    hwp = x_ref.shape[-1]
    x = x_ref[...].astype(jnp.float32)                      # (N, TC, HWp)

    # Mean: reduce the batch axis first (pure VALU), then a single cross-lane
    # (XLU) reduce per channel row.
    xb = jnp.sum(x, axis=0, keepdims=True)                  # (1, TC, HWp)
    mean = jnp.sum(xb, axis=-1, keepdims=True) * inv_n      # (1, TC, 1)

    # Two-pass, centered variance inside the VMEM tile: no E[x^2]-E[x]^2
    # catastrophic cancellation (matches PyTorch's effectively two-pass BN).
    xc = x - mean
    if hw_true != hwp:                                      # static: mask zero padding
        valid = lax.broadcasted_iota(jnp.int32, (1, 1, hwp), 2) < hw_true
        xc_sq = jnp.where(valid, xc, 0.0)
    else:
        xc_sq = xc
    vb = jnp.sum(xc_sq * xc_sq, axis=0, keepdims=True)      # (1, TC, HWp)
    var = jnp.sum(vb, axis=-1, keepdims=True) * inv_n       # biased batch variance

    inv = lax.rsqrt(var + eps)
    y = xc * (inv * wb_ref[0:1]) + wb_ref[1:2]              # folded scale/shift
    o_ref[...] = jnp.where(y >= 0.0, y, negative_slope * y).astype(o_ref.dtype)

    stat_ref[0:1] = mean
    stat_ref[1:2] = var


def _bn_stats_kernel(inv_n, x_ref, stat_ref):
    """Fallback stats pass: accumulate per-channel sum / sum-of-squares over HW
    chunks (grid axis 1, 'arbitrary'); finalize to mean / biased variance on the
    last chunk.  Zero-padding of HW is harmless (contributes 0 to both sums)."""
    h = pl.program_id(1)

    @pl.when(h == 0)
    def _():
        stat_ref[...] = jnp.zeros_like(stat_ref)

    x = x_ref[...].astype(jnp.float32)                      # (N, TC, chunk)
    xb = jnp.sum(x, axis=0, keepdims=True)                  # batch axis first (VALU)
    sb = jnp.sum(x * x, axis=0, keepdims=True)
    stat_ref[0:1] += jnp.sum(xb, axis=-1, keepdims=True)    # (1, TC, 1)
    stat_ref[1:2] += jnp.sum(sb, axis=-1, keepdims=True)

    @pl.when(h == pl.num_programs(1) - 1)
    def _():
        mean = stat_ref[0:1] * inv_n
        # TODO(synk): chunked shifted accumulation would avoid the (clamped)
        # E[x^2]-E[x]^2 cancellation on this rarely-used fallback path.
        var = jnp.maximum(stat_ref[1:2] * inv_n - mean * mean, 0.0)
        stat_ref[0:1] = mean
        stat_ref[1:2] = var


def _scale_shift_lrelu_kernel(negative_slope, x_ref, ss_ref, o_ref):
    """Fallback apply pass: y = leaky_relu(x * scale + shift) on one HW chunk."""
    x = x_ref[...].astype(jnp.float32)
    y = x * ss_ref[0:1] + ss_ref[1:2]
    o_ref[...] = jnp.where(y >= 0.0, y, negative_slope * y).astype(o_ref.dtype)


# ------------------------------ host wrappers -------------------------------- #
_PAD_OVERHEAD_LIMIT = 1.2      # pad HW to a 128 multiple only if it grows <= 20%


def _fused_single_pass(x_ncl, wb, eps, negative_slope, hw_true, tc, vmem_capacity):
    """Single HBM read + single HBM write path (stats + apply fused)."""
    N, C, HWp = x_ncl.shape
    itemsize = int(x_ncl.dtype.itemsize)
    inv_n = 1.0 / float(N * hw_true)

    kernel = functools.partial(_bn_lrelu_kernel, float(eps), float(negative_slope),
                               inv_n, int(hw_true))
    x_spec = pl.BlockSpec((N, tc, HWp), lambda c: (0, c, 0))
    p_spec = pl.BlockSpec((2, tc, 1), lambda c: (0, c, 0))

    cost = pl.CostEstimate(
        flops=10 * N * C * HWp,
        transcendentals=C,
        bytes_accessed=2 * N * C * HWp * itemsize + 16 * C)

    y, stats = pl.pallas_call(
        kernel,
        out_shape=(jax.ShapeDtypeStruct((N, C, HWp), x_ncl.dtype),
                   jax.ShapeDtypeStruct((2, C, 1), jnp.float32)),
        grid=(C // tc,),
        in_specs=[x_spec, p_spec],
        out_specs=(x_spec, p_spec),
        compiler_params=pltpu.CompilerParams(
            dimension_semantics=("parallel",),     # shards channels across v7x TCs
            vmem_limit_bytes=_vmem_limit_bytes(N * tc * HWp, itemsize, vmem_capacity)),
        cost_estimate=cost,
    )(x_ncl, wb)
    return y, stats


def _fused_two_pass(x_ncl, bn_weight, bn_bias, eps, negative_slope, vmem_capacity):
    """Fallback for tiles that do not fit VMEM (e.g. N=32, 112x112 first layers):
    HW-chunked stats grid ('arbitrary' reduction axis) then an HW-chunked apply
    grid.  Costs one extra HBM read of x but works for arbitrarily large N*H*W."""
    N, C, HW = x_ncl.shape
    itemsize = int(x_ncl.dtype.itemsize)
    pack = _sublane_pack(itemsize)
    tc = pack if C % pack == 0 else C

    budget = vmem_capacity // 3
    per_lane = 4 * N * tc * itemsize + 2 * N * tc * 4        # VMEM bytes per HW element
    chunk = max(128, (budget // per_lane) // 128 * 128)
    chunk = min(chunk, pl.cdiv(HW, 128) * 128)
    n_hw = pl.cdiv(HW, chunk)
    HWpad = n_hw * chunk
    if HWpad != HW:
        x_ncl = jnp.pad(x_ncl, ((0, 0), (0, 0), (0, HWpad - HW)))

    inv_n = 1.0 / float(N * HW)
    grid = (C // tc, n_hw)
    x_spec = pl.BlockSpec((N, tc, chunk), lambda c, h: (0, c, h))
    p_spec = pl.BlockSpec((2, tc, 1), lambda c, h: (0, c, 0))
    vmem_limit = _vmem_limit_bytes(N * tc * chunk, itemsize, vmem_capacity)

    stats = pl.pallas_call(
        functools.partial(_bn_stats_kernel, inv_n),
        out_shape=jax.ShapeDtypeStruct((2, C, 1), jnp.float32),
        grid=grid,
        in_specs=[x_spec],
        out_specs=p_spec,
        compiler_params=pltpu.CompilerParams(
            dimension_semantics=("parallel", "arbitrary"),
            vmem_limit_bytes=vmem_limit),
    )(x_ncl)

    mean = stats[0, :, 0]
    var = stats[1, :, 0]
    inv = lax.rsqrt(var + float(eps))
    scale = bn_weight.astype(jnp.float32) * inv
    shift = bn_bias.astype(jnp.float32) - mean * scale
    ss = jnp.stack([scale, shift], axis=0).reshape(2, C, 1)

    y = pl.pallas_call(
        functools.partial(_scale_shift_lrelu_kernel, float(negative_slope)),
        out_shape=jax.ShapeDtypeStruct((N, C, HWpad), x_ncl.dtype),
        grid=grid,
        in_specs=[x_spec, p_spec],
        out_specs=x_spec,
        compiler_params=pltpu.CompilerParams(
            dimension_semantics=("parallel", "parallel"),
            vmem_limit_bytes=vmem_limit),
    )(x_ncl, ss)

    if HWpad != HW:
        y = y[..., :HW]
    return y, stats


def fused_batchnorm_leaky_relu(x_nchw, bn_weight, bn_bias, *, eps,
                               negative_slope=0.01, channel_tile=None,
                               force_fallback=False):
    """x_nchw: (N, C, H, W) conv output WITHOUT the conv bias.
    Returns (y (N,C,H,W), batch_mean (C,), batch_var_biased (C,)), where the
    statistics are those of x_nchw itself (the caller adds the conv bias to the
    mean; the bias cancels inside the normalization)."""
    N, C, H, W = x_nchw.shape
    HW = H * W
    x_ncl = x_nchw.reshape(N, C, HW)     # free: trailing-dim merge, no transpose
    itemsize = int(x_ncl.dtype.itemsize)
    vmem_capacity = _vmem_capacity_bytes()

    # Lane alignment: pad HW to a 128 multiple when the overhead is small so the
    # output stores are unmasked vst (store path is the biggest measured lever).
    HWp = HW
    if HW % 128 != 0:
        padded = pl.cdiv(HW, 128) * 128
        if padded <= _PAD_OVERHEAD_LIMIT * HW:
            HWp = padded

    if force_fallback:
        tc = None
    elif channel_tile is not None:
        tc = int(channel_tile)
        assert C % tc == 0, "channel tile must divide the channel count"
        if tc * _bytes_per_channel(N, HWp, itemsize) > vmem_capacity // 2:
            tc = None                    # user tile too big -> graceful fallback
    else:
        tc = _choose_channel_tile(N, HWp, C, itemsize, vmem_capacity)

    if tc is None:
        y, stats = _fused_two_pass(x_ncl, bn_weight, bn_bias, eps, negative_slope,
                                   vmem_capacity)
    else:
        x_in = x_ncl if HWp == HW else jnp.pad(x_ncl, ((0, 0), (0, 0), (0, HWp - HW)))
        wb = jnp.stack([bn_weight.astype(jnp.float32),
                        bn_bias.astype(jnp.float32)], axis=0).reshape(2, C, 1)
        y, stats = _fused_single_pass(x_in, wb, eps, negative_slope, HW, tc,
                                      vmem_capacity)
        if HWp != HW:
            y = y[..., :HW]

    bmean = stats[0, :, 0]
    bvar = stats[1, :, 0]
    return y.reshape(N, C, H, W), bmean, bvar


# --------------------------- Module equivalents ----------------------------- #
class MetaConv2dLayer:
    """Forward-only JAX port of MetaConv2dLayer (conv stays in XLA)."""

    def __init__(self, key, in_channels, out_channels, kernel_size, stride=1,
                 padding=0, use_bias=True, groups=1, dilation_rate=1):
        self.stride = int(stride)
        self.padding = int(padding)
        self.dilation_rate = int(dilation_rate)
        self.use_bias = use_bias
        self.groups = int(groups)
        fan_in = in_channels * kernel_size * kernel_size
        fan_out = out_channels * kernel_size * kernel_size
        bound = math.sqrt(6.0 / (fan_in + fan_out))        # xavier_uniform_
        self.weight = jax.random.uniform(
            key, (out_channels, in_channels, kernel_size, kernel_size),
            jnp.float32, minval=-bound, maxval=bound)
        self.bias = jnp.zeros((out_channels,), jnp.float32) if use_bias else None

    def conv_no_bias(self, x, weight=None):
        w = self.weight if weight is None else weight
        return lax.conv_general_dilated(
            x, w,
            window_strides=(self.stride, self.stride),
            padding=[(self.padding, self.padding)] * 2,
            rhs_dilation=(self.dilation_rate, self.dilation_rate),
            feature_group_count=self.groups,
            dimension_numbers=("NCHW", "OIHW", "NCHW"),
        )


class MetaBatchNormLayer:
    """Forward-only JAX port of MetaBatchNormLayer (state + param selection).
    The normalization math itself runs inside the fused Pallas kernels."""

    def __init__(self, num_features, args, eps=1e-5, momentum=0.1,
                 use_per_step_bn_statistics=False):
        self.num_features = num_features
        self.eps = eps
        self.momentum = momentum
        self.use_per_step_bn_statistics = use_per_step_bn_statistics
        self.args = args

        if use_per_step_bn_statistics:
            steps = args["number_of_training_steps_per_iter"]
            self.running_mean = jnp.zeros((steps, num_features), jnp.float32)
            self.running_var = jnp.ones((steps, num_features), jnp.float32)
            self.bias = jnp.zeros((steps, num_features), jnp.float32)
            self.weight = jnp.ones((steps, num_features), jnp.float32)
        else:
            self.running_mean = jnp.zeros((num_features,), jnp.float32)
            # NOTE: zeros (not ones) to match the reference module verbatim.
            self.running_var = jnp.zeros((num_features,), jnp.float32)
            self.bias = jnp.zeros((num_features,), jnp.float32)
            self.weight = jnp.ones((num_features,), jnp.float32)

        if args.get("enable_inner_loop_optimizable_bn_params", False):
            self.bias = jnp.zeros((num_features,), jnp.float32)
            self.weight = jnp.ones((num_features,), jnp.float32)

        self.backup_running_mean = jnp.zeros_like(self.running_mean)
        self.backup_running_var = jnp.ones_like(self.running_var)

    def select_params(self, num_step, params=None):
        if params is not None:
            weight, bias = params["weight"], params["bias"]
        else:
            weight, bias = self.weight, self.bias
        if self.use_per_step_bn_statistics and params is None and not \
                self.args.get("enable_inner_loop_optimizable_bn_params", False):
            weight, bias = self.weight[num_step], self.bias[num_step]
        return weight, bias

    def backup_stats(self):
        if self.use_per_step_bn_statistics:
            self.backup_running_mean = self.running_mean
            self.backup_running_var = self.running_var

    def restore_backup_stats(self):
        if self.use_per_step_bn_statistics:
            self.running_mean = self.backup_running_mean
            self.running_var = self.backup_running_var

    def update_running_stats(self, num_step, batch_mean, batch_var_biased, n):
        # In the reference module, running stats are only tracked (and updated by
        # F.batch_norm) in the per-step branch; otherwise None is passed and
        # nothing is updated.
        if not self.use_per_step_bn_statistics:
            return
        unbiased = batch_var_biased * (float(n) / float(max(n - 1, 1)))
        m = self.momentum
        self.running_mean = self.running_mean.at[num_step].set(
            (1.0 - m) * self.running_mean[num_step] + m * batch_mean)
        self.running_var = self.running_var.at[num_step].set(
            (1.0 - m) * self.running_var[num_step] + m * unbiased)


class MetaConvNormLayerReLU:
    """Conv2d -> BatchNorm(training=True) -> leaky_relu; norm + activation fused
    in Pallas TPU kernels (the conv bias cancels inside the normalization)."""

    def __init__(self, input_shape, num_filters, kernel_size, stride, padding,
                 use_bias, args, normalization=True, key=None):
        self.args = args
        self.normalization = normalization
        self.num_filters = num_filters
        key = jax.random.PRNGKey(0) if key is None else key
        self.conv = MetaConv2dLayer(key, input_shape[1], num_filters,
                                    kernel_size, stride, padding, use_bias)
        if normalization:
            if args["norm_layer"] == "batch_norm":
                self.norm_layer = MetaBatchNormLayer(
                    num_filters, args,
                    use_per_step_bn_statistics=args["per_step_bn_statistics"])
            else:
                # TODO(synk): layer_norm branch of the reference module is not
                # implemented; only the batch_norm path is fused in Pallas.
                raise NotImplementedError("layer_norm branch not implemented")

    def forward(self, x, num_step, params=None, training=False,
                backup_running_statistics=False, channel_tile=None):
        conv_params = None
        bn_params = None
        if params is not None:
            conv_params = params.get("conv")
            bn_params = params.get("norm_layer")

        conv_w = None if conv_params is None else conv_params.get("weight")
        conv_out = self.conv.conv_no_bias(x, conv_w)           # bias handled below
        C = conv_out.shape[1]
        if conv_params is not None and conv_params.get("bias") is not None:
            conv_bias = conv_params["bias"]
        elif self.conv.use_bias:
            conv_bias = self.conv.bias
        else:
            conv_bias = jnp.zeros((C,), jnp.float32)

        if not self.normalization:
            out = conv_out + conv_bias.reshape(1, C, 1, 1)
            return jnp.where(out >= 0, out, 0.01 * out)

        if backup_running_statistics:
            self.norm_layer.backup_stats()
        weight, bias = self.norm_layer.select_params(num_step, bn_params)

        y, bmean, bvar = fused_batchnorm_leaky_relu(
            conv_out, weight, bias,
            eps=self.norm_layer.eps, negative_slope=0.01,
            channel_tile=channel_tile)

        # The conv bias cancels inside the normalization; it only shifts the
        # batch mean used for the running-statistics momentum update.
        bmean = bmean + conv_bias.astype(jnp.float32)
        n_reduce = conv_out.shape[0] * conv_out.shape[2] * conv_out.shape[3]
        self.norm_layer.update_running_stats(num_step, bmean, bvar, n_reduce)
        return y

    def restore_backup_stats(self):
        if self.normalization:
            self.norm_layer.restore_backup_stats()


# --------------------------------- main ------------------------------------ #
if __name__ == "__main__":
    key = jax.random.PRNGKey(0)
    k_x, k_w, k_x3 = jax.random.split(key, 3)

    N, Cin, H, W = 2, 3, 16, 16
    num_filters, ksize, stride, padding = 16, 3, 1, 1
    steps = 5
    num_step = 2

    args = {
        "number_of_training_steps_per_iter": steps,
        "learnable_bn_gamma": True,
        "learnable_bn_beta": True,
        "enable_inner_loop_optimizable_bn_params": False,
        "per_step_bn_statistics": True,
        "norm_layer": "batch_norm",
    }

    layer = MetaConvNormLayerReLU(
        input_shape=(N, Cin, H, W), num_filters=num_filters,
        kernel_size=ksize, stride=stride, padding=padding, use_bias=True,
        args=args, normalization=True, key=k_w)

    # Deterministic, non-trivial BN affine + conv bias so the fused
    # scale/shift/stat path is exercised.
    C = num_filters
    layer.norm_layer.weight = 1.0 + 0.1 * jnp.arange(
        steps * C, dtype=jnp.float32).reshape(steps, C)
    layer.norm_layer.bias = 0.05 * jnp.arange(
        steps * C, dtype=jnp.float32).reshape(steps, C)
    layer.conv.bias = 0.3 * jnp.arange(C, dtype=jnp.float32)

    x = jax.random.normal(k_x, (N, Cin, H, W), dtype=jnp.float32)

    rm_before = layer.norm_layer.running_mean[num_step]
    rv_before = layer.norm_layer.running_var[num_step]

    # ---- Test 1: full layer forward, auto-chosen channel tile (grid >= 2). ----
    y = layer.forward(x, num_step=num_step, training=True,
                      backup_running_statistics=True)
    y = jax.block_until_ready(y)

    # Pure-JAX reference: conv2d(+bias) -> batch_norm(train) -> leaky_relu.
    conv_ref = lax.conv_general_dilated(
        x, layer.conv.weight, (stride, stride), [(padding, padding)] * 2,
        dimension_numbers=("NCHW", "OIHW", "NCHW"))
    conv_ref = conv_ref + layer.conv.bias.reshape(1, C, 1, 1)
    mean_ref = jnp.mean(conv_ref, axis=(0, 2, 3), keepdims=True)
    var_ref = jnp.mean((conv_ref - mean_ref) ** 2, axis=(0, 2, 3), keepdims=True)
    w_bn = layer.norm_layer.weight[num_step].reshape(1, C, 1, 1)
    b_bn = layer.norm_layer.bias[num_step].reshape(1, C, 1, 1)
    bn_ref = ((conv_ref - mean_ref) * lax.rsqrt(var_ref + layer.norm_layer.eps)
              * w_bn + b_bn)
    y_ref = jnp.where(bn_ref >= 0, bn_ref, 0.01 * bn_ref)

    assert y.shape == (N, C, H, W)
    assert jnp.max(jnp.abs(y - y_ref)) < 1e-4, "forward mismatch vs reference"

    # Running-stat momentum update (F.batch_norm uses the unbiased batch var).
    L = N * H * W
    mom = layer.norm_layer.momentum
    rm_ref = (1 - mom) * rm_before + mom * mean_ref.reshape(C)
    rv_ref = (1 - mom) * rv_before + mom * var_ref.reshape(C) * (L / (L - 1))
    assert jnp.max(jnp.abs(
        layer.norm_layer.running_mean[num_step] - rm_ref)) < 1e-4
    assert jnp.max(jnp.abs(
        layer.norm_layer.running_var[num_step] - rv_ref)) < 1e-4

    # ---- Test 2: forced two-pass fallback path (HW-chunked stats + apply). ----
    conv_nb = layer.conv.conv_no_bias(x)
    y_fb, m_fb, v_fb = fused_batchnorm_leaky_relu(
        conv_nb, layer.norm_layer.weight[num_step], layer.norm_layer.bias[num_step],
        eps=layer.norm_layer.eps, force_fallback=True)
    y_fb = jax.block_until_ready(y_fb)
    # The conv bias cancels in BN, so the fallback output matches the reference.
    assert jnp.max(jnp.abs(y_fb - y_ref)) < 1e-4, "fallback path mismatch"
    assert jnp.max(jnp.abs(v_fb - var_ref.reshape(C))) < 1e-4

    # ---- Test 3: lane-padded primary path (HW = 900 -> padded to 1024). ----
    C3, H3 = 16, 30
    x3 = jax.random.normal(k_x3, (2, C3, H3, H3), jnp.float32)
    g3 = 1.0 + 0.05 * jnp.arange(C3, dtype=jnp.float32)
    b3 = 0.02 * jnp.arange(C3, dtype=jnp.float32)
    y3, m3, v3 = fused_batchnorm_leaky_relu(x3, g3, b3, eps=1e-5)
    y3 = jax.block_until_ready(y3)

    mean3 = jnp.mean(x3, axis=(0, 2, 3))
    var3 = jnp.mean((x3 - mean3.reshape(1, C3, 1, 1)) ** 2, axis=(0, 2, 3))
    bn3 = ((x3 - mean3.reshape(1, C3, 1, 1))
           * lax.rsqrt(var3.reshape(1, C3, 1, 1) + 1e-5)
           * g3.reshape(1, C3, 1, 1) + b3.reshape(1, C3, 1, 1))
    ref3 = jnp.where(bn3 >= 0, bn3, 0.01 * bn3)
    assert jnp.max(jnp.abs(y3 - ref3)) < 1e-4, "padded-path mismatch"
    assert jnp.max(jnp.abs(m3 - mean3)) < 1e-4
    assert jnp.max(jnp.abs(v3 - var3)) < 1e-4

    print("KERNEL_OK")
</pallas_src>

<mosaic_0001>
module attributes {stable_mosaic.version = 11 : i64} {
  func.func @_bn_lrelu_kernel(%arg0: i32, %arg1: memref<2x8x256xf32, #tpu.memory_space<vmem>>, %arg2: memref<2x8x1xf32, #tpu.memory_space<vmem>>, %arg3: memref<2x8x256xf32, #tpu.memory_space<vmem>>, %arg4: memref<2x8x1xf32, #tpu.memory_space<vmem>>) attributes {dimension_semantics = [#tpu.dimension_semantics<parallel>], iteration_bounds = array<i64: 2>, scalar_prefetch = 0 : i64, scratch_operands = 0 : i64, tpu.core_type = #tpu.core_type<tc>, window_params = [{transform_indices = @transform_0, window_bounds = array<i64: 2, 8, 256>}, {transform_indices = @transform_1, window_bounds = array<i64: 2, 8, 1>}, {transform_indices = @transform_2, window_bounds = array<i64: 2, 8, 256>}, {transform_indices = @transform_3, window_bounds = array<i64: 2, 8, 1>}]} {
    %c0 = arith.constant 0 : index
    %c0_0 = arith.constant 0 : index
    %c0_1 = arith.constant 0 : index
    %0 = vector.load %arg1[%c0, %c0_0, %c0_1] : memref<2x8x256xf32, #tpu.memory_space<vmem>>, vector<2x8x256xf32>
    %cst = arith.constant dense<0.000000e+00> : vector<8x256xf32>
    %1 = vector.multi_reduction <add>, %0, %cst [0] : vector<2x8x256xf32> to vector<8x256xf32>
    %2 = vector.shape_cast %1 : vector<8x256xf32> to vector<1x8x256xf32>
    %cst_2 = arith.constant dense<0.000000e+00> : vector<1x8xf32>
    %3 = vector.multi_reduction <add>, %2, %cst_2 [2] : vector<1x8x256xf32> to vector<1x8xf32>
    %4 = vector.shape_cast %3 : vector<1x8xf32> to vector<1x8x1xf32>
    %cst_3 = arith.constant 0.001953125 : f32
    %5 = vector.broadcast %cst_3 : f32 to vector<1x8x1xf32>
    %6 = arith.mulf %4, %5 : vector<1x8x1xf32>
    %7 = vector.broadcast %6 : vector<1x8x1xf32> to vector<2x8x256xf32>
    %8 = arith.subf %0, %7 : vector<2x8x256xf32>
    %9 = arith.mulf %8, %8 : vector<2x8x256xf32>
    %cst_4 = arith.constant dense<0.000000e+00> : vector<8x256xf32>
    %10 = vector.multi_reduction <add>, %9, %cst_4 [0] : vector<2x8x256xf32> to vector<8x256xf32>
    %11 = vector.shape_cast %10 : vector<8x256xf32> to vector<1x8x256xf32>
    %cst_5 = arith.constant dense<0.000000e+00> : vector<1x8xf32>
    %12 = vector.multi_reduction <add>, %11, %cst_5 [2] : vector<1x8x256xf32> to vector<1x8xf32>
    %13 = vector.shape_cast %12 : vector<1x8xf32> to vector<1x8x1xf32>
    %cst_6 = arith.constant 0.001953125 : f32
    %14 = vector.broadcast %cst_6 : f32 to vector<1x8x1xf32>
    %15 = arith.mulf %13, %14 : vector<1x8x1xf32>
    %cst_7 = arith.constant 9.99999974E-6 : f32
    %16 = vector.broadcast %cst_7 : f32 to vector<1x8x1xf32>
    %17 = arith.addf %15, %16 : vector<1x8x1xf32>
    %18 = math.rsqrt %17 : vector<1x8x1xf32>
    %c0_8 = arith.constant 0 : index
    %c0_9 = arith.constant 0 : index
    %c0_10 = arith.constant 0 : index
    %19 = vector.load %arg2[%c0_8, %c0_9, %c0_10] : memref<2x8x1xf32, #tpu.memory_space<vmem>>, vector<1x8x1xf32>
    %20 = arith.mulf %18, %19 : vector<1x8x1xf32>
    %21 = vector.broadcast %20 : vector<1x8x1xf32> to vector<2x8x256xf32>
    %22 = arith.mulf %8, %21 : vector<2x8x256xf32>
    %c1 = arith.constant 1 : index
    %c0_11 = arith.constant 0 : index
    %c0_12 = arith.constant 0 : index
    %23 = vector.load %arg2[%c1, %c0_11, %c0_12] : memref<2x8x1xf32, #tpu.memory_space<vmem>>, vector<1x8x1xf32>
    %24 = vector.broadcast %23 : vector<1x8x1xf32> to vector<2x8x256xf32>
    %25 = arith.addf %22, %24 : vector<2x8x256xf32>
    %cst_13 = arith.constant 0.000000e+00 : f32
    %26 = vector.broadcast %cst_13 : f32 to vector<2x8x256xf32>
    %27 = arith.cmpf oge, %25, %26 : vector<2x8x256xf32>
    %cst_14 = arith.constant 0.00999999977 : f32
    %28 = vector.broadcast %cst_14 : f32 to vector<2x8x256xf32>
    %29 = arith.mulf %28, %25 : vector<2x8x256xf32>
    %30 = arith.select %27, %25, %29 : vector<2x8x256xi1>, vector<2x8x256xf32>
    %c0_15 = arith.constant 0 : index
    %c0_16 = arith.constant 0 : index
    %c0_17 = arith.constant 0 : index
    %31 = vector.load %arg3[%c0_15, %c0_16, %c0_17] : memref<2x8x256xf32, #tpu.memory_space<vmem>>, vector<2x8x256xf32>
    tpu.vector_store %arg3[%c0_15, %c0_16, %c0_17], %30 {strides = array<i32>} : memref<2x8x256xf32, #tpu.memory_space<vmem>>, vector<2x8x256xf32>,
    %c0_18 = arith.constant 0 : index
    %c0_19 = arith.constant 0 : index
    %c0_20 = arith.constant 0 : index
    %32 = vector.load %arg4[%c0_18, %c0_19, %c0_20] : memref<2x8x1xf32, #tpu.memory_space<vmem>>, vector<1x8x1xf32>
    tpu.vector_store %arg4[%c0_18, %c0_19, %c0_20], %6 {strides = array<i32>} : memref<2x8x1xf32, #tpu.memory_space<vmem>>, vector<1x8x1xf32>,
    %c1_21 = arith.constant 1 : index
    %c0_22 = arith.constant 0 : index
    %c0_23 = arith.constant 0 : index
    %33 = vector.load %arg4[%c1_21, %c0_22, %c0_23] : memref<2x8x1xf32, #tpu.memory_space<vmem>>, vector<1x8x1xf32>
    tpu.vector_store %arg4[%c1_21, %c0_22, %c0_23], %15 {strides = array<i32>} : memref<2x8x1xf32, #tpu.memory_space<vmem>>, vector<1x8x1xf32>,
    return
  }
  func.func @transform_0(%arg0: i32) -> (i32, i32, i32) {
    %c0_i32 = arith.constant 0 : i32
    %c0_i32_0 = arith.constant 0 : i32
    %c0_i32_1 = arith.constant 0 : i32
    return %c0_i32, %arg0, %c0_i32_0 : i32, i32, i32
  }
  func.func @transform_1(%arg0: i32) -> (i32, i32, i32) {
    %c0_i32 = arith.constant 0 : i32
    %c0_i32_0 = arith.constant 0 : i32
    %c0_i32_1 = arith.constant 0 : i32
    return %c0_i32, %arg0, %c0_i32_0 : i32, i32, i32
  }
  func.func @transform_2(%arg0: i32) -> (i32, i32, i32) {
    %c0_i32 = arith.constant 0 : i32
    %c0_i32_0 = arith.constant 0 : i32
    %c0_i32_1 = arith.constant 0 : i32
    return %c0_i32, %arg0, %c0_i32_0 : i32, i32, i32
  }
  func.func @transform_3(%arg0: i32) -> (i32, i32, i32) {
    %c0_i32 = arith.constant 0 : i32
    %c0_i32_0 = arith.constant 0 : i32
    %c0_i32_1 = arith.constant 0 : i32
    return %c0_i32, %arg0, %c0_i32_0 : i32, i32, i32
  }
}

</mosaic_0001>

<bundles_post_ra>
// kernel: tpu_custom_call.1
= control target key start
LH: loop header
LB: loop body
LE: loop exit
PB: predicated region body
PF: predicated region fallthrough
CT: control target
= control target key end

     0   :  { %9 = vsyncpa [#allocation3], 0  ;;  %s879_s0 = inlined_call_operand.hbm [shape: f32[2,16,256], index: 0, kind: input, shape index: {}]   ;;  %s880_s1 = inlined_call_operand.vmem [shape: f32[2,16,1], index: 1, kind: input, shape index: {}]   ;;  %s881_s2 = inlined_call_operand.hbm [shape: f32[2,16,256], index: 2, kind: output, shape index: {0}]   ;;  %s882_s3 = inlined_call_operand.vmem [shape: f32[2,16,1], index: 3, kind: output, shape index: {1}]  }
   0x1   :  { %11 = vsyncpa [#allocation3 + $0x1], 0 }
   0x2   :  { %12 = vsyncpa [#allocation4], 0 }
   0x3   :  { %14 = vsyncpa [#allocation4 + $0x1], 0  ;;  %s699_s12 = smov 0   ;;  %s701_s13 = smov 0  }
   0x4   :  { %s703_s14 = smov 0   ;;  %s705_s15 = smov 0  }
   0x5 LB: > { %s720_s16 = sadd.s32 4294967295, %s668_s15   ;;  %s502_s17 = sadd.s32 4294967294, %s668_s15   ;;  %s668_s15 = sphi %s705_s15, %s895_s15   ;;  %s664_s14 = sphi %s703_s14, %s894_s14   ;;  %s660_s13 = sphi %s701_s13, %s893_s13   ;;  %s656_s12 = sphi %s699_s12, %s892_s12  }
   0x6   : > { %s724_s18 = sadd.s32 1, %s668_s15   ;;  %s27_s19 = sadd.s32 1, %s664_s14 }
   0x7   : > { %s24_s20 = ssub.s32 %s668_s15, %s724_s18  ;;  %p34_p0 = scmp.ne.s32.totalorder %s664_s14, %s660_s13 }
   0x8   : > { %p25_p1 = scmp.eq.s32.totalorder %s24_s20, 0  ;;  %p35_p2 = scmp.eq.s32.totalorder %s668_s15, 0 }
   0x9   : > { %p40_p3 = scmp.ne.s32.totalorder %s660_s13, %s656_s12  ;;  %p41_p4 = scmp.eq.s32.totalorder %s720_s16, 0 }
   0xa   : > { %s736_s21 = scalar_select %p25_p1, %s664_s14, %s27_s19  }
   0xb   : > { %p738_p5 = por %p35_p2, %p34_p0  ;;  %p742_p6 = por %p41_p4, %p40_p3 }
   0xc   : > { %p90_p7 = scmp.eq.s32.totalorder %s720_s16, 1  ;;  %p96_p8 = scmp.eq.s32.totalorder %s502_s17, 1 }
   0xd   : > { %p883_p11 = scmp.ge.s32.totalorder %s668_s15, 2 }
   0xe   : > { %p747_p9 = por %p90_p7, %p34_p0  ;;  %p751_p10 = por %p96_p8, %p40_p3 }
   0xf   : > { %138 = sbr.rel (%p883_p11) target bundleno = 48 (0x30), region = 16  ;;  %s759_s26 = sand.u32 (!%p883_p11), 1, %s664_s14  }
  0x10   : > { %s887_s24 = scalar_select %p747_p9, 1, 0 }
  0x11   : > { %s888_s25 = scalar_select %p751_p10, 1, 0 }
  0x12   : > { %s524_s27 = sshll.u32 (!%p883_p11), %s668_s15, 8  ;;  %s505_s28 = sshll.u32 (!%p883_p11), %s759_s26, 5 }
  0x13   : > { %s766_s4 = scalar_lea.hbm (!%p883_p11), %s879_s0, %s524_s27  ;;  %s146_s5 = scalar_lea.vmem (!%p883_p11), [#allocation2], %s505_s28 }
  0x14   : > { %s153_s6 = sshll.u32 %s146_s5, 4  ;;  %s143_s7 = scalar_lea.sflag [#allocation3], %s759_s26  ;;  %s768_s6 = int_to_ptr.vmem [resolvable:$true] %s153_s6 }
  0x15   : > { %s578_s8 = scalar_lea.hbm %s766_s4, 512  ;;  %s582_s11 = scalar_lea.hbm %s879_s0, 1024 }
  0x16   : > { %p579_p12 = scmp.ne.s32.totalorder %s766_s4, %s578_s8  ;;  %p583_p1 = scmp.lt.s32.totalorder %s766_s4, %s879_s0 }
  0x17   : > { %p584_p2 = scmp.lt.s32.totalorder %s582_s11, %s578_s8 }
  0x18   : > { %p580_p13 = pnand %p579_p12, %p738_p5 }
  0x19   : > { %p585_p3 = por %p584_p2, %p583_p1 }
  0x1a   : > { %p581_p0 = pneg %p580_p13 }
  0x1c   : > { %p586_p4 = pnand %p585_p3, %p581_p0 }
  0x1e   : > { %589 = shalt.err (!%p586_p4)
}
  0x1f   : > { %s590_s20 = scalar_lea.vmem %s768_s6, 512  ;;  %s670_s27 = smov [#allocation2]  }
  0x20   : > { %p591_p7 = scmp.ne.s32.totalorder %s768_s6, %s590_s20  ;;  %s594_s28 = sshll.u32 %s670_s27, 4  ;;  %s595_s28 = int_to_ptr.vmem [resolvable:$false] %s594_s28 }
  0x21   : > { %s596_s29 = scalar_lea.vmem %s595_s28, 1024  ;;  %p597_p13 = scmp.lt.s32.totalorder %s768_s6, %s595_s28 }
  0x22   : > { %p592_p8 = pnand %p591_p7, %p738_p5  ;;  %p598_p11 = scmp.lt.s32.totalorder %s596_s29, %s590_s20 }
  0x24   : > { %p593_p12 = pneg %p592_p8  ;;  %p599_p10 = por %p598_p11, %p597_p13 }
  0x26   : > { %p600_p9 = pnand %p599_p10, %p593_p12 }
  0x28   : > { %603 = shalt.err (!%p600_p9)
}
  0x29   : > { %s671_s30 = smov 512   ;;  %s672_s5 = smov 256  }
  0x2a   : > { %s673_s8 = smov 16   ;;  %162 = sbr.rel (!%p738_p5) target bundleno = 48 (0x30), region = 24 }
  0x2b   : > { %526 = dma.hbm_to_vmem [thread:$0]  (%p738_p5), %s766_s4, 512, %s768_s6, %s143_s7, %s671_s30, %s672_s5, %s673_s8  }
  0x2c   : > { %s508_s9 = sshll.u32 (%p738_p5), %s759_s26, 4  ;;  %s509_s10 = sshll.u32 (%p738_p5), %s668_s15, 3 }
  0x2d   : > { %s168_s19 = scalar_lea.vmem (%p738_p5), %s880_s1, %s509_s10  ;;  %s166_s20 = scalar_lea.vmem (%p738_p5), [#allocation5], %s508_s9 }
  0x2e   : > { %v199_v0 = vld [vmem:[%s168_s19] sm:$0xff] (%p738_p5)  ;;  %v201_v1 = vld [vmem:[%s168_s19 + $0x10] sm:$0xff] (%p738_p5) }
  0x2f   : > { %200 = vst [vmem:[%s166_s20] sm:$0xff] %v199_v0  ;;  %202 = vst [vmem:[%s166_s20 + $0x8] sm:$0xff] %v201_v1 }
  0x30 PF: > { %p510_p9 = scmp.ge.s32.totalorder %s668_s15, 1  ;;  %p207_p10 = scmp.lt.s32.totalorder %s668_s15, 3 }
  0x32   : > { %p208_p5 = pnand %p510_p9, %p207_p10 }
  0x33   : > { %s803_s22 = sand.u32 (!%p208_p5), 1, %s660_s13  }
  0x34   : > { %211 = sbr.rel (%p208_p5) target bundleno = 523 (0x20b), region = 62  ;;  %s511_s26 = sshll.u32 (!%p208_p5), %s803_s22, 5 }
  0x35   : > { %s214_s4 = scalar_lea.sflag (!%p208_p5), [#allocation3], %s803_s22  ;;  %s217_s6 = scalar_lea.vmem (!%p208_p5), [#allocation2], %s511_s26 }
  0x39   : > { %647 = dma.done.wait (%p742_p6), %s214_s4, 512  }
  0x3a   : > { %649 = vsyncadd (%p742_p6), %s214_s4, 4294966784  ;;  %v255_v2 = vld [vmem:[%s217_s6] sm:$0xff]  ;;  %v256_v3 = vld [vmem:[%s217_s6 + $0x8] sm:$0xff]  ;;  %s512_s7 = sshll.u32 %s803_s22, 4  ;;  %vm319_vm0 = vcmask 7168   ;;  %v674_v22 = vmov 0  }
  0x3b   : > { %v257_v4 = vld [vmem:[%s217_s6 + $0x10] sm:$0xff]  ;;  %v258_v5 = vld [vmem:[%s217_s6 + $0x18] sm:$0xff]  ;;  %s814_s27 = scalar_lea.vmem [#allocation7], %s512_s7  ;;  %574 = vset.pattern.permute.xlu1 %v674_v22  ;;  %575 = vset.pattern.permute.xlu0 %v674_v22  ;;  %s225_s23 = scalar_lea.vmem [#allocation5], %s512_s7 }
  0x3c   : > { %v259_v6 = vadd.f32 %v257_v4, %v255_v2  ;;  %v260_v7 = vadd.f32 %v258_v5, %v256_v3  ;;  %v281_v26 = vld [vmem:[%s225_s23] sm:$0xff]  ;;  %v515_v29 = vld [vmem:[%s225_s23 + $0x8] sm:$0xff]  ;;  %s248_s28 = scalar_lea.vmem [#allocation6], %s511_s26  ;;  %s525_s30 = sshll.u32 %s720_s16, 8 }
  0x3d   : > { %s341_s29 = sshll.u32 %s248_s28, 4  ;;  %s828_s9 = scalar_lea.hbm %s881_s2, %s525_s30  ;;  %s823_s29 = int_to_ptr.vmem [resolvable:$true] %s341_s29 }
  0x3e   : > { %v261_v8 = vadd.f32 %v260_v7, %v259_v6  ;;  %s324_s10 = scalar_lea.sflag [#allocation4], %s803_s22  ;;  %s604_s11 = scalar_lea.vmem %s823_s29, 512 }
  0x3f   : > { %p605_p6 = scmp.ne.s32.totalorder %s823_s29, %s604_s11  ;;  %p889_p11 = scmp.ne.s32.totalorder %s887_s24, 0 }
  0x40   : > { %262 = vadd.xlane.f32.xlu0 %v261_v8  ;;  %s675_s17 = smov [#allocation6]  }
  0x41   : > { %p606_p0 = pnand %p605_p6, %p889_p11  ;;  %s608_s19 = sshll.u32 %s675_s17, 4  ;;  %s609_s19 = int_to_ptr.vmem [resolvable:$false] %s608_s19 }
  0x42   : > { %s610_s20 = scalar_lea.vmem %s609_s19, 1024  ;;  %p611_p2 = scmp.lt.s32.totalorder %s823_s29, %s609_s19 }
  0x43   : > { %p607_p1 = pneg %p606_p0  ;;  %p612_p3 = scmp.lt.s32.totalorder %s610_s20, %s604_s11 }
  0x45   : > { %p613_p4 = por %p612_p3, %p611_p2 }
  0x47   : > { %p614_p7 = pnand %p613_p4, %p607_p1 }
  0xc9   : > { %v263_v9 = vpop.xlane.xlu0 %262 }
  0xca   : > { %v264_v10 = vmul.f32 0.001953125, %v263_v9 }
  0xcc   : > { %v265_v11 = vsub.f32 %v255_v2, %v264_v10  ;;  %v266_v12 = vsub.f32 %v256_v3, %v264_v10  ;;  %v267_v13 = vsub.f32 %v257_v4, %v264_v10  ;;  %v268_v14 = vsub.f32 %v258_v5, %v264_v10  ;;  %320 = vst.msk [vmem:[%s814_s27] sm:$0xff] %vm319_vm0, %v264_v10 }
  0xce   : > { %v269_v15 = vmul.f32 %v265_v11, %v265_v11  ;;  %v270_v16 = vmul.f32 %v266_v12, %v266_v12  ;;  %v271_v17 = vmul.f32 %v267_v13, %v267_v13  ;;  %v272_v18 = vmul.f32 %v268_v14, %v268_v14 }
  0xd0   : > { %v273_v19 = vadd.f32 %v271_v17, %v269_v15  ;;  %v274_v20 = vadd.f32 %v272_v18, %v270_v16 }
  0xd2   : > { %v275_v21 = vadd.f32 %v274_v20, %v273_v19 }
  0xd4   : > { %276 = vadd.xlane.f32.xlu0 %v275_v21 }
 0x15d   : > { %v277_v23 = vpop.xlane.xlu0 %276 }
 0x15e   : > { %v278_v24 = vmul.f32 0.001953125, %v277_v23 }
 0x160   : > { %v279_v25 = vadd.f32 1e-05, %v278_v24  ;;  %516 = vst.msk [vmem:[%s814_s27 + $0x8] sm:$0xff] %vm319_vm0, %v278_v24 }
 0x162   : > { %576 = vrsqrt.f32 %v279_v25 }
 0x16f   : > { %v577_v27 = vpop.eup %576 }
 0x170   : > { %v282_v28 = vmul.f32 %v577_v27, %v281_v26 }
 0x172   : > { %285 = vperm.xlu1 %574, %v282_v28  }
 0x176   : > { %296 = vperm.xlu1 %574, %v515_v29  }
 0x1ed   : > { %v286_v30 = vpop.permute.xlu1 %285 }
 0x1ee   : > { %v288_v31 = vmul.f32 %v286_v30, %v265_v11  ;;  %v289_v32 = vmul.f32 %v286_v30, %v266_v12  ;;  %v290_v33 = vmul.f32 %v286_v30, %v267_v13  ;;  %v291_v34 = vmul.f32 %v286_v30, %v268_v14 }
 0x1f1   : > { %v297_v35 = vpop.permute.xlu1 %296 }
 0x1f2   : > { %v299_v36 = vadd.f32 %v297_v35, %v288_v31  ;;  %v300_v37 = vadd.f32 %v297_v35, %v289_v32  ;;  %v301_v38 = vadd.f32 %v297_v35, %v290_v33  ;;  %v302_v39 = vadd.f32 %v297_v35, %v291_v34 }
 0x1f4   : > { %vm303_vm1 = vcmp.ge.f32.partialorder %v299_v36, 0.0  ;;  %vm304_vm2 = vcmp.ge.f32.partialorder %v300_v37, 0.0  ;;  %vm305_vm3 = vcmp.ge.f32.partialorder %v301_v38, 0.0  ;;  %vm306_vm4 = vcmp.ge.f32.partialorder %v302_v39, 0.0 }
 0x1f5   : > { %v307_v40 = vmul.f32 0.01, %v299_v36  ;;  %v308_v41 = vmul.f32 0.01, %v300_v37  ;;  %v309_v42 = vmul.f32 0.01, %v301_v38 }
 0x1f6   : > { %v310_v43 = vmul.f32 0.01, %v302_v39 }
 0x1f7   : > { %v311_v44 = vsel %vm303_vm1, %v299_v36, %v307_v40  ;;  %v312_v45 = vsel %vm304_vm2, %v300_v37, %v308_v41  ;;  %v313_v46 = vsel %vm305_vm3, %v301_v38, %v309_v42 }
 0x1f8   : > { %v314_v47 = vsel %vm306_vm4, %v302_v39, %v310_v43  ;;  %315 = vst [vmem:[%s248_s28] sm:$0xff] %v311_v44  ;;  %316 = vst [vmem:[%s248_s28 + $0x8] sm:$0xff] %v312_v45 }
 0x1f9   : > { %317 = vst [vmem:[%s248_s28 + $0x10] sm:$0xff] %v313_v46  ;;  %318 = vst [vmem:[%s248_s28 + $0x18] sm:$0xff] %v314_v47 }
 0x1fa   : > { %617 = shalt.err (!%p614_p7)
}
 0x1fb   : > { %s618_s26 = scalar_lea.hbm %s828_s9, 512  ;;  %s622_s7 = scalar_lea.hbm %s881_s2, 1024 }
 0x1fc   : > { %p619_p8 = scmp.ne.s32.totalorder %s828_s9, %s618_s26  ;;  %p623_p9 = scmp.lt.s32.totalorder %s828_s9, %s881_s2 }
 0x1fd   : > { %p624_p10 = scmp.lt.s32.totalorder %s622_s7, %s618_s26 }
 0x1fe   : > { %p620_p12 = pnand %p619_p8, %p889_p11 }
 0x1ff   : > { %p625_p5 = por %p624_p10, %p623_p9 }
 0x200   : > { %p621_p13 = pneg %p620_p12 }
 0x202   : > { %p626_p6 = pnand %p625_p5, %p621_p13 }
 0x204   : > { %629 = shalt.err (!%p626_p6)
}
 0x205   : > { %s676_s30 = smov 256   ;;  %s677_s5 = smov 512   ;;  %v383_v48 = vld [vmem:[%s814_s27] sm:$0xff] (%p889_p11)  ;;  %v385_v49 = vld [vmem:[%s814_s27 + $0x8] sm:$0xff] (%p889_p11) }
 0x206   : > { %s678_s8 = smov 16   ;;  %350 = sbr.rel (!%p889_p11) target bundleno = 523 (0x20b), region = 78 }
 0x207   : > { %528 = dma.vmem_to_hbm [thread:$0]  (%p889_p11), %s823_s29, 512, %s828_s9, %s324_s10, %s676_s30, %s677_s5, %s678_s8  }
 0x208   : > { %s521_s11 = sshll.u32 (%p889_p11), %s720_s16, 3 }
 0x209   : > { %s352_s20 = scalar_lea.vmem (%p889_p11), %s882_s3, %s521_s11 }
 0x20a   : > { %384 = vst [vmem:[%s352_s20] sm:$0xff] (%p889_p11), %v383_v48  ;;  %386 = vst [vmem:[%s352_s20 + $0x10] sm:$0xff] (%p889_p11), %v385_v49 }
 0x20b PF: > { %s398_s22 = sand.u32 1, %s656_s12   ;;  %p890_p0 = scmp.ne.s32.totalorder %s888_s25, 0 }
 0x20c   : > { %p891_p11 = scmp.ge.s32.totalorder %s668_s15, 2  ;;  %s399_s24 = scalar_lea.sflag [#allocation4], %s398_s22 }
 0x20e   : > { %p531_p1 = pnand %p891_p11, %p890_p0 }
 0x210   : > { %p532_p2 = pneg %p531_p1 }
 0x212   : > { %651 = dma.done.wait (%p532_p2), %s399_s24, 512  }
 0x213   : > { %653 = vsyncadd (%p532_p2), %s399_s24, 4294966784  ;;  %p17_p3 = scmp.ge.s32.totalorder %s724_s18, 4   ;;  %s892_s12 = smov %s660_s13 }
 0x214   : > { %s893_s13 = smov %s664_s14  ;;  %s894_s14 = smov %s736_s21 }
 0x215   : > { %s895_s15 = smov %s724_s18  ;;  %19 = sbr.rel (!%p17_p3) target bundleno = 5 (0x5), region = 171 }
 0x21a   :  { %411 = vsyncpa [#allocation3], 1 }
 0x21b   :  { %413 = vsyncpa [#allocation3 + $0x1], 1 }
 0x21c   :  { %414 = vsyncpa [#allocation4], 1 }
 0x21d   :  { %416 = vsyncpa [#allocation4 + $0x1], 1 }

</bundles_post_ra>
